<compile_context>
chip_gen: v6e
topology: v6e:2x2x1
jax: 0.10.0
libtpu: 0.0.40
codegen_flags: <defaults>
</compile_context>

<pallas_src>
import functools

import jax
import jax.numpy as jnp
from jax.experimental import pallas as pl
from jax.experimental.pallas import tpu as pltpu


def _gemm_cat_kernel(x_ref, w_ref, o_ref, acc_ref):
    # x_ref:   (tm, tk)  bf16 tile of flattened input rows
    # w_ref:   (tk, tn)  bf16 tile of the fused, transposed weight [w1.T | w2.T]
    # o_ref:   (tm, tn)  bf16 output tile (lane-dense, single unmasked store)
    # acc_ref: (tm, tn)  f32 accumulator, resident across the K grid axis
    @pl.when(pl.program_id(2) == 0)
    def _():
        acc_ref[...] = jnp.zeros_like(acc_ref)

    acc_ref[...] += jnp.dot(
        x_ref[...], w_ref[...], preferred_element_type=jnp.float32
    )

    @pl.when(pl.program_id(2) == pl.num_programs(2) - 1)
    def _():
        o_ref[...] = acc_ref[...].astype(o_ref.dtype)


def _round_up(x, m):
    return (x + m - 1) // m * m


def fuse_weights(w1, w2):
    """Precompute the fused, transposed weight (K, 2N).

    For inference-style repeated calls, call this ONCE and reuse the result
    with `gemm_cat_fused` so the transpose/concat HBM copy is not paid per call.
    """
    return jnp.concatenate([jnp.transpose(w1), jnp.transpose(w2)], axis=1)


@functools.partial(jax.jit, static_argnames=("tm", "tn", "tk"))
def gemm_cat_fused(x, w, *, tm=256, tn=256, tk=512):
    """x: (..., K); w: (K, 2N) fused weight.  Returns (..., 2N)."""
    orig_shape = x.shape
    K = orig_shape[-1]
    Ntot = w.shape[1]

    x2d = x.reshape(-1, K)
    M = x2d.shape[0]

    # Clamp tiles to the (aligned) problem size: keep M tiles a multiple of 16
    # (bf16 sublane packing) and K/N tiles a multiple of 128 (lane width).
    tm = min(tm, _round_up(M, 16))
    tk = min(tk, _round_up(K, 128))
    tn = min(tn, _round_up(Ntot, 128))

    Mp = _round_up(M, tm)
    Kp = _round_up(K, tk)
    Np = _round_up(Ntot, tn)

    xp = x2d
    if (Mp, Kp) != (M, K):
        xp = jnp.pad(x2d, ((0, Mp - M), (0, Kp - K)))
    wp = w
    if (Kp, Np) != (K, Ntot):
        wp = jnp.pad(w, ((0, Kp - K), (0, Np - Ntot)))

    out = pl.pallas_call(
        _gemm_cat_kernel,
        out_shape=jax.ShapeDtypeStruct((Mp, Np), x.dtype),
        grid_spec=pltpu.PrefetchScalarGridSpec(
            num_scalar_prefetch=0,
            grid=(Mp // tm, Np // tn, Kp // tk),
            in_specs=[
                pl.BlockSpec((tm, tk), lambda i, j, k: (i, k)),  # x rows tile
                pl.BlockSpec((tk, tn), lambda i, j, k: (k, j)),  # fused weight tile
            ],
            out_specs=pl.BlockSpec((tm, tn), lambda i, j, k: (i, j)),
            scratch_shapes=[pltpu.VMEM((tm, tn), jnp.float32)],
        ),
        compiler_params=pltpu.CompilerParams(
            dimension_semantics=("parallel", "parallel", "arbitrary"),
        ),
    )(xp, wp)

    out = out[:M, :Ntot]
    return out.reshape(*orig_shape[:-1], Ntot)


def gemm_cat(x, w1, w2, *, tm=256, tn=256, tk=512):
    """x: (..., K) bf16; w1, w2: (out, K) bf16 (PyTorch nn.Linear layout).

    Returns (..., 2*out) bf16 == torch.cat([x @ w1.T, x @ w2.T], dim=-1).
    """
    return gemm_cat_fused(x, fuse_weights(w1, w2), tm=tm, tn=tn, tk=tk)


if __name__ == "__main__":
    # Small shapes consistent with the module: batch=2, seq=8, hidden=32.
    batch, seq, in_features, out_features = 2, 8, 32, 32

    key = jax.random.PRNGKey(0)
    kx, kw1, kw2 = jax.random.split(key, 3)

    x = jax.random.normal(kx, (batch, seq, in_features), dtype=jnp.float32).astype(
        jnp.bfloat16
    )
    # Deterministic "nn.Linear" weights: (out_features, in_features), no bias.
    w1 = jax.random.uniform(
        kw1, (out_features, in_features), jnp.float32, -0.1, 0.1
    ).astype(jnp.bfloat16)
    w2 = jax.random.uniform(
        kw2, (out_features, in_features), jnp.float32, -0.1, 0.1
    ).astype(jnp.bfloat16)

    y = gemm_cat(x, w1, w2)
    jax.block_until_ready(y)

    # Reference check against plain JAX (same semantics as the torch module).
    xf = x.astype(jnp.float32)
    ref = jnp.concatenate(
        [xf @ w1.astype(jnp.float32).T, xf @ w2.astype(jnp.float32).T], axis=-1
    )
    assert y.shape == (batch, seq, 2 * out_features), y.shape
    assert y.dtype == jnp.bfloat16
    err = jnp.max(jnp.abs(y.astype(jnp.float32) - ref))
    assert err < 5e-2, float(err)

    print("KERNEL_OK")
</pallas_src>

<mosaic_0001>
module attributes {stable_mosaic.version = 11 : i64} {
  func.func @_gemm_cat_kernel(%arg0: i32, %arg1: i32, %arg2: i32, %arg3: memref<16x128xbf16, #tpu.memory_space<vmem>>, %arg4: memref<128x128xbf16, #tpu.memory_space<vmem>>, %arg5: memref<16x128xbf16, #tpu.memory_space<vmem>>, %arg6: memref<16x128xf32, #tpu.memory_space<vmem>>) attributes {dimension_semantics = [#tpu.dimension_semantics<parallel>, #tpu.dimension_semantics<parallel>, #tpu.dimension_semantics<arbitrary>], iteration_bounds = array<i64: 1, 1, 1>, scalar_prefetch = 0 : i64, scratch_operands = 1 : i64, tpu.core_type = #tpu.core_type<tc>, window_params = [{transform_indices = @transform_0, window_bounds = array<i64: 16, 128>}, {transform_indices = @transform_1, window_bounds = array<i64: 128, 128>}, {transform_indices = @transform_2, window_bounds = array<i64: 16, 128>}]} {
    %c0_i32 = arith.constant 0 : i32
    %0 = arith.cmpi eq, %arg2, %c0_i32 : i32
    %1 = arith.extui %0 : i1 to i32
    %c0_i32_0 = arith.constant 0 : i32
    %2 = arith.cmpi ne, %1, %c0_i32_0 : i32
    scf.if %2 {
      %cst_10 = arith.constant 0.000000e+00 : f32
      %12 = vector.broadcast %cst_10 : f32 to vector<16x128xf32>
      %c0_11 = arith.constant 0 : index
      %c0_12 = arith.constant 0 : index
      %13 = vector.load %arg6[%c0_11, %c0_12] : memref<16x128xf32, #tpu.memory_space<vmem>>, vector<16x128xf32>
      tpu.vector_store %arg6[%c0_11, %c0_12], %12 {strides = array<i32>} : memref<16x128xf32, #tpu.memory_space<vmem>>, vector<16x128xf32>,
    } else {
    }
    %c0 = arith.constant 0 : index
    %c0_1 = arith.constant 0 : index
    %3 = vector.load %arg6[%c0, %c0_1] : memref<16x128xf32, #tpu.memory_space<vmem>>, vector<16x128xf32>
    %c0_2 = arith.constant 0 : index
    %c0_3 = arith.constant 0 : index
    %4 = vector.load %arg3[%c0_2, %c0_3] : memref<16x128xbf16, #tpu.memory_space<vmem>>, vector<16x128xbf16>
    %c0_4 = arith.constant 0 : index
    %c0_5 = arith.constant 0 : index
    %5 = vector.load %arg4[%c0_4, %c0_5] : memref<128x128xbf16, #tpu.memory_space<vmem>>, vector<128x128xbf16>
    %cst = arith.constant dense<0.000000e+00> : vector<16x128xf32>
    %6 = tpu.matmul %4, %5, %cst {dimension_numbers = #tpu.dot_dimension_numbers<[1], [0], [0], [1], [0, 0, 1, 1], [], []>} : vector<16x128xbf16>, vector<128x128xbf16>, vector<16x128xf32> -> vector<16x128xf32>
    %7 = arith.addf %3, %6 : vector<16x128xf32>
    %c0_6 = arith.constant 0 : index
    %c0_7 = arith.constant 0 : index
    %8 = vector.load %arg6[%c0_6, %c0_7] : memref<16x128xf32, #tpu.memory_space<vmem>>, vector<16x128xf32>
    tpu.vector_store %arg6[%c0_6, %c0_7], %7 {strides = array<i32>} : memref<16x128xf32, #tpu.memory_space<vmem>>, vector<16x128xf32>,
    %c0_i32_8 = arith.constant 0 : i32
    %9 = arith.cmpi eq, %arg2, %c0_i32_8 : i32
    %10 = arith.extui %9 : i1 to i32
    %c0_i32_9 = arith.constant 0 : i32
    %11 = arith.cmpi ne, %10, %c0_i32_9 : i32
    scf.if %11 {
      %c0_10 = arith.constant 0 : index
      %c0_11 = arith.constant 0 : index
      %12 = vector.load %arg6[%c0_10, %c0_11] : memref<16x128xf32, #tpu.memory_space<vmem>>, vector<16x128xf32>
      %13 = arith.truncf %12 : vector<16x128xf32> to vector<16x128xbf16>
      %c0_12 = arith.constant 0 : index
      %c0_13 = arith.constant 0 : index
      %14 = vector.load %arg5[%c0_12, %c0_13] : memref<16x128xbf16, #tpu.memory_space<vmem>>, vector<16x128xbf16>
      tpu.vector_store %arg5[%c0_12, %c0_13], %13 {strides = array<i32>} : memref<16x128xbf16, #tpu.memory_space<vmem>>, vector<16x128xbf16>,
    } else {
    }
    return
  }
  func.func @transform_0(%arg0: i32, %arg1: i32, %arg2: i32) -> (i32, i32) {
    %c0_i32 = arith.constant 0 : i32
    return %arg0, %arg2 : i32, i32
  }
  func.func @transform_1(%arg0: i32, %arg1: i32, %arg2: i32) -> (i32, i32) {
    %c0_i32 = arith.constant 0 : i32
    return %arg2, %arg1 : i32, i32
  }
  func.func @transform_2(%arg0: i32, %arg1: i32, %arg2: i32) -> (i32, i32) {
    %c0_i32 = arith.constant 0 : i32
    return %arg0, %arg1 : i32, i32
  }
}

</mosaic_0001>

<bundles_post_ra>
// kernel: gemm_cat_fused.1
= control target key start
LH: loop header
LB: loop body
LE: loop exit
PB: predicated region body
PF: predicated region fallthrough
CT: control target
= control target key end

     0   :  { %v214_v0 = vmov 0.0   ;;  %vm215_vm0 = vmmov 0   ;;  %s261_s1 = inlined_call_operand.vmem [shape: bf16[128,128], index: 1, kind: input, shape index: {}]   ;;  %s262_s0 = inlined_call_operand.vmem [shape: bf16[16,128], index: 0, kind: input, shape index: {}]   ;;  %s263_s2 = inlined_call_operand.vmem [shape: bf16[16,128], index: 2, kind: output, shape index: {}]  }
   0x1   :  { %183 = vmatprep.subr.bf16.mxu0 %v214_v0  ;;  %v205_v1 = vld [vmem:[%s261_s1 + $0x38] sm:$0xff]   ;;  %199 = vmatprep.mubr.msk.bf16.mxu0 %vm215_vm0, %v214_v0  ;;  %v206_v2 = vld [vmem:[%s261_s1 + $0x30] sm:$0xff]   ;;  %v207_v3 = vld [vmem:[%s261_s1 + $0x28] sm:$0xff]  }
   0x2   :  { %184 = vmatpush3.bf16.msra.mxu0 %v205_v1  ;;  %v208_v4 = vld [vmem:[%s261_s1 + $0x20] sm:$0xff]   ;;  %v209_v5 = vld [vmem:[%s261_s1 + $0x18] sm:$0xff]   ;;  %v210_v6 = vld [vmem:[%s261_s1 + $0x10] sm:$0xff]  }
   0x3   :  { %185 = vmatprep.subr.bf16.mxu0 %v214_v0  ;;  %v211_v7 = vld [vmem:[%s261_s1 + $0x8] sm:$0xff]   ;;  %v212_v8 = vld [vmem:[%s261_s1] sm:$0xff]  }
   0x4   :  { %v213_v9 = vld [vmem:[%s262_s0] sm:$0xff]  }
   0x6   :  { %186 = vmatpush3.bf16.msra.mxu0 %v206_v2 }
   0x7   :  { %187 = vmatprep.subr.bf16.mxu0 %v214_v0 }
   0xa   :  { %188 = vmatpush3.bf16.msra.mxu0 %v207_v3 }
   0xb   :  { %189 = vmatprep.subr.bf16.mxu0 %v214_v0 }
   0xe   :  { %190 = vmatpush3.bf16.msra.mxu0 %v208_v4 }
   0xf   :  { %191 = vmatprep.subr.bf16.mxu0 %v214_v0 }
  0x12   :  { %192 = vmatpush3.bf16.msra.mxu0 %v209_v5 }
  0x13   :  { %193 = vmatprep.subr.bf16.mxu0 %v214_v0 }
  0x16   :  { %194 = vmatpush3.bf16.msra.mxu0 %v210_v6 }
  0x17   :  { %195 = vmatprep.subr.bf16.mxu0 %v214_v0 }
  0x1a   :  { %196 = vmatpush3.bf16.msra.mxu0 %v211_v7 }
  0x1b   :  { %197 = vmatprep.subr.bf16.mxu0 %v214_v0 }
  0x1e   :  { %198 = vmatpush3.bf16.msra.mxu0 %v212_v8 }
  0x21   :  { %200 = vmatmul.mubr.bf16.vlgmr.msra.gmra.mxu0 %v213_v9 }
  0xe1   :  { %v126_v10 = vpop.f32.mrf.mxu0 }
  0xe3   :  { %v201_v11 = vpop.f32.mrf.mxu0 }
  0xe5   :  { %v129_v12 = vpop.f32.mrf.mxu0 }
  0xe6   :  { %v172_v13 = vpack.c.bf16 %v129_v12, %v126_v10 }
  0xe7   :  { %v202_v14 = vpop.f32.mrf.mxu0 }
  0xe8   :  { %173 = vst [vmem:[%s263_s2] sm:$0xff] %v172_v13  }

</bundles_post_ra>
